<compile_context>
chip_gen: v5e
topology: v5e:2x2
jax: 0.10.0
libtpu: 0.0.40
codegen_flags: <defaults>
</compile_context>

<pallas_src>
import functools
import math

import jax
import jax.numpy as jnp
from jax.experimental import pallas as pl
from jax.experimental.pallas import tpu as pltpu


def _round_up(x, m):
    return (x + m - 1) // m * m


def _cdiv(a, b):
    return -(-a // b)


# ----------------------------------------------------------------------------
# Single fused kernel: 5 GEMMs + fused bias / ReLU / sigmoid (or softmax)
# ----------------------------------------------------------------------------
def _fused_disc_kernel(x_ref, a1, b1, a2, b2, a3, b3, a4, b4, a5, b5, o_ref,
                       *, num_labels):
    def dense(h, a_ref, b_ref):
        # bf16 operands on the MXU, f32 accumulate, f32 bias epilogue.
        return jnp.dot(h, a_ref[...],
                       preferred_element_type=jnp.float32) + b_ref[...]

    h = x_ref[...]                                      # (TB, 768) bf16
    for a_ref, b_ref in ((a1, b1), (a2, b2), (a3, b3), (a4, b4)):
        h = jnp.maximum(dense(h, a_ref, b_ref), 0.0).astype(jnp.bfloat16)

    y = dense(h, a5, b5)                                # (TB, 128) f32 logits
    if num_labels == 1:
        # exp on the EUP, approx reciprocal on the EUP; clip guards approx rcp.
        y = jnp.clip(pl.reciprocal(1.0 + jnp.exp(-y), approx=True), 0.0, 1.0)
    else:
        # softmax over the real label columns only (padded columns masked off)
        col = jax.lax.broadcasted_iota(jnp.int32, y.shape, 1)
        y = jnp.where(col < num_labels, y, -1e30)
        y = y - jnp.max(y, axis=-1, keepdims=True)
        e = jnp.exp(y)
        y = e * pl.reciprocal(jnp.sum(e, axis=-1, keepdims=True), approx=True)
    o_ref[...] = y.astype(o_ref.dtype)


# ----------------------------------------------------------------------------
# One-time parameter preparation (hoisted out of the forward pass)
# ----------------------------------------------------------------------------
def prepare_params(params, imSize=16, fSize=2, numLabels=1):
    """Densify each conv into its (d_in, d_out) linear operator in PyTorch
    NCHW-flatten order, pad everything to lane-dense (multiples of 128)
    bf16 blocks, and pad biases to f32 (1, 128k) rows.  Runs once."""
    layer_defs = [("w1", "b1", 3), ("w2", "b2", fSize),
                  ("w3", "b3", 2 * fSize), ("w4", "b4", 4 * fSize)]
    mats, biases = [], []
    s = imSize
    for wname, bname, cin in layer_defs:
        w = params[wname]                               # (Cout, Cin, 5, 5)
        d_in = cin * s * s
        eye = jnp.eye(d_in, dtype=jnp.float32).reshape(d_in, cin, s, s)
        out = jax.lax.conv_general_dilated(
            eye, w, window_strides=(2, 2), padding=((2, 2), (2, 2)),
            dimension_numbers=("NCHW", "OIHW", "NCHW"))
        so = s // 2
        mats.append(out.reshape(d_in, -1))              # (d_in, Cout*so*so)
        biases.append(jnp.repeat(params[bname], so * so))
        s = so
    # Final nn.Linear: y = feat @ W.T + b  (feat is the NCHW flatten, matching
    # PyTorch's x.view(N, -1) since we keep NCHW-flatten order throughout).
    mats.append(params["w5"].T)                         # (feat, numLabels)
    biases.append(params["b5"])

    layers = []
    in_pad = _round_up(mats[0].shape[0], 128)
    for a, b in zip(mats, biases):
        out_pad = _round_up(a.shape[1], 128)
        a_p = jnp.pad(a, ((0, in_pad - a.shape[0]), (0, out_pad - a.shape[1])))
        b_p = jnp.pad(b, (0, out_pad - b.shape[0])).reshape(1, out_pad)
        layers.append((a_p.astype(jnp.bfloat16), b_p.astype(jnp.float32)))
        in_pad = out_pad

    total_bytes = sum(a.size * 2 + b.size * 4 for a, b in layers)
    # TODO(synk): fall back to a per-layer im2col GEMM pipeline when the
    # densified operators would not comfortably fit v7x's 64 MiB VMEM.
    assert total_bytes < 24 * 1024 * 1024, "imSize too large for fused path"
    return tuple(layers)


# ----------------------------------------------------------------------------
# Forward pass: reshape/pad/cast -> ONE pallas_call -> slice
# ----------------------------------------------------------------------------
def discriminator_forward(x_nchw, layers, *, num_labels):
    N, C, H, W = x_nchw.shape
    d_in = C * H * W
    in_pad = layers[0][0].shape[0]
    out_pad = layers[-1][0].shape[1]

    # Batch tiling: >= 2 tiles once the batch is big enough so the "parallel"
    # grid axis shards across v7x's two TensorCores; bf16 sublane pack = 16.
    grid_b = max(1, _cdiv(N, 256))
    if N >= 32:
        grid_b = max(grid_b, 2)
    tile_b = _round_up(_cdiv(N, grid_b), 16)
    b_pad = tile_b * grid_b

    xf = x_nchw.reshape(N, d_in).astype(jnp.bfloat16)   # NCHW flatten order
    xf = jnp.pad(xf, ((0, b_pad - N), (0, in_pad - d_in)))

    in_specs = [pl.BlockSpec((tile_b, in_pad), lambda i: (i, 0))]
    flat_args = [xf]
    for a_p, b_p in layers:
        # Constant index maps -> weights/biases DMA'd once, VMEM-resident.
        in_specs.append(pl.BlockSpec(a_p.shape, lambda i: (0, 0)))
        in_specs.append(pl.BlockSpec(b_p.shape, lambda i: (0, 0)))
        flat_args += [a_p, b_p]

    # VMEM budget from actual buffer sizes (x/out double-buffered) + headroom.
    weight_bytes = sum(a.size * 2 + b.size * 4 for a, b in layers)
    io_bytes = 2 * (tile_b * in_pad * 2 + tile_b * out_pad * 4)
    vmem_bytes = int(min(40 << 20, max(8 << 20, 6 * (weight_bytes + io_bytes))))

    out = pl.pallas_call(
        functools.partial(_fused_disc_kernel, num_labels=num_labels),
        out_shape=jax.ShapeDtypeStruct((b_pad, out_pad), jnp.float32),
        grid_spec=pltpu.PrefetchScalarGridSpec(
            num_scalar_prefetch=0,
            grid=(grid_b,),
            in_specs=in_specs,
            out_specs=pl.BlockSpec((tile_b, out_pad), lambda i: (i, 0)),
        ),
        compiler_params=pltpu.CompilerParams(
            dimension_semantics=("parallel",),
            vmem_limit_bytes=vmem_bytes,
        ),
    )(*flat_args)
    return out[:N, :num_labels]


# ----------------------------------------------------------------------------
# Deterministic parameters (shapes from DISCRIMINATOR.__init__)
# ----------------------------------------------------------------------------
def make_params(key, imSize=16, fSize=2, numLabels=1):
    inSize = imSize // 2 ** 4
    shapes = {
        "w1": (fSize, 3, 5, 5),
        "w2": (fSize * 2, fSize, 5, 5),
        "w3": (fSize * 4, fSize * 2, 5, 5),
        "w4": (fSize * 8, fSize * 4, 5, 5),
        "w5": (numLabels, fSize * 8 * inSize * inSize),
    }
    params = {}
    for name, shp in shapes.items():
        key, kw, kb = jax.random.split(key, 3)
        fan_in = math.prod(shp[1:])
        bound = 1.0 / (fan_in ** 0.5)
        params[name] = jax.random.uniform(kw, shp, jnp.float32, -bound, bound)
        params["b" + name[1:]] = jax.random.uniform(
            kb, (shp[0],), jnp.float32, -bound, bound)
    return params


# Pure-JAX f32 reference (sanity check of the Pallas path).
def _reference_forward(x_nchw, params):
    def conv(x, w, b):
        y = jax.lax.conv_general_dilated(
            x, w, window_strides=(2, 2), padding=((2, 2), (2, 2)),
            dimension_numbers=("NCHW", "OIHW", "NCHW"))
        return jax.nn.relu(y + b[None, :, None, None])
    x = conv(x_nchw, params["w1"], params["b1"])
    x = conv(x, params["w2"], params["b2"])
    x = conv(x, params["w3"], params["b3"])
    x = conv(x, params["w4"], params["b4"])
    feat = x.reshape(x.shape[0], -1)
    logits = feat @ params["w5"].T + params["b5"]
    if logits.shape[1] == 1:
        return jax.nn.sigmoid(logits)
    return jax.nn.softmax(logits, axis=-1)


if __name__ == "__main__":
    imSize, fSize, numLabels, batch = 16, 2, 1, 2
    key = jax.random.PRNGKey(0)
    kx, kp = jax.random.split(key)
    x = jax.random.normal(kx, (batch, 3, imSize, imSize), jnp.float32)
    params = make_params(kp, imSize=imSize, fSize=fSize, numLabels=numLabels)

    # One-time weight prep (hoisted out of the forward pass).
    layers = prepare_params(params, imSize=imSize, fSize=fSize,
                            numLabels=numLabels)

    fwd = jax.jit(functools.partial(discriminator_forward,
                                    num_labels=numLabels))
    out = jax.block_until_ready(fwd(x, layers))

    assert out.shape == (batch, numLabels)
    assert bool(jnp.all((out >= 0.0) & (out <= 1.0)))
    ref = _reference_forward(x, params)
    assert bool(jnp.allclose(out, ref, atol=5e-2)), (out, ref)
    print("KERNEL_OK")
</pallas_src>

<mosaic_0001>
module attributes {stable_mosaic.version = 11 : i64} {
  func.func @_fused_disc_kernel(%arg0: i32, %arg1: memref<16x768xbf16, #tpu.memory_space<vmem>>, %arg2: memref<768x128xbf16, #tpu.memory_space<vmem>>, %arg3: memref<1x128xf32, #tpu.memory_space<vmem>>, %arg4: memref<128x128xbf16, #tpu.memory_space<vmem>>, %arg5: memref<1x128xf32, #tpu.memory_space<vmem>>, %arg6: memref<128x128xbf16, #tpu.memory_space<vmem>>, %arg7: memref<1x128xf32, #tpu.memory_space<vmem>>, %arg8: memref<128x128xbf16, #tpu.memory_space<vmem>>, %arg9: memref<1x128xf32, #tpu.memory_space<vmem>>, %arg10: memref<128x128xbf16, #tpu.memory_space<vmem>>, %arg11: memref<1x128xf32, #tpu.memory_space<vmem>>, %arg12: memref<16x128xf32, #tpu.memory_space<vmem>>) attributes {dimension_semantics = [#tpu.dimension_semantics<parallel>], iteration_bounds = array<i64: 1>, scalar_prefetch = 0 : i64, scratch_operands = 0 : i64, tpu.core_type = #tpu.core_type<tc>, window_params = [{transform_indices = @transform_0, window_bounds = array<i64: 16, 768>}, {pipeline_mode = #tpu.pipeline_mode<synchronous>, transform_indices = @transform_1, window_bounds = array<i64: 768, 128>}, {pipeline_mode = #tpu.pipeline_mode<synchronous>, transform_indices = @transform_2, window_bounds = array<i64: 1, 128>}, {pipeline_mode = #tpu.pipeline_mode<synchronous>, transform_indices = @transform_3, window_bounds = array<i64: 128, 128>}, {pipeline_mode = #tpu.pipeline_mode<synchronous>, transform_indices = @transform_4, window_bounds = array<i64: 1, 128>}, {pipeline_mode = #tpu.pipeline_mode<synchronous>, transform_indices = @transform_5, window_bounds = array<i64: 128, 128>}, {pipeline_mode = #tpu.pipeline_mode<synchronous>, transform_indices = @transform_6, window_bounds = array<i64: 1, 128>}, {pipeline_mode = #tpu.pipeline_mode<synchronous>, transform_indices = @transform_7, window_bounds = array<i64: 128, 128>}, {pipeline_mode = #tpu.pipeline_mode<synchronous>, transform_indices = @transform_8, window_bounds = array<i64: 1, 128>}, {pipeline_mode = #tpu.pipeline_mode<synchronous>, transform_indices = @transform_9, window_bounds = array<i64: 128, 128>}, {pipeline_mode = #tpu.pipeline_mode<synchronous>, transform_indices = @transform_10, window_bounds = array<i64: 1, 128>}, {transform_indices = @transform_11, window_bounds = array<i64: 16, 128>}]} {
    %c0 = arith.constant 0 : index
    %c0_0 = arith.constant 0 : index
    %0 = vector.load %arg1[%c0, %c0_0] : memref<16x768xbf16, #tpu.memory_space<vmem>>, vector<16x768xbf16>
    %c0_1 = arith.constant 0 : index
    %c0_2 = arith.constant 0 : index
    %1 = vector.load %arg2[%c0_1, %c0_2] : memref<768x128xbf16, #tpu.memory_space<vmem>>, vector<768x128xbf16>
    %cst = arith.constant dense<0.000000e+00> : vector<16x128xf32>
    %2 = tpu.matmul %0, %1, %cst {dimension_numbers = #tpu.dot_dimension_numbers<[1], [0], [0], [1], [0, 0, 1, 1], [], []>} : vector<16x768xbf16>, vector<768x128xbf16>, vector<16x128xf32> -> vector<16x128xf32>
    %c0_3 = arith.constant 0 : index
    %c0_4 = arith.constant 0 : index
    %3 = vector.load %arg3[%c0_3, %c0_4] : memref<1x128xf32, #tpu.memory_space<vmem>>, vector<1x128xf32>
    %4 = vector.broadcast %3 : vector<1x128xf32> to vector<16x128xf32>
    %5 = arith.addf %2, %4 : vector<16x128xf32>
    %cst_5 = arith.constant 0.000000e+00 : f32
    %6 = vector.broadcast %cst_5 : f32 to vector<16x128xf32>
    %7 = arith.maximumf %5, %6 : vector<16x128xf32>
    %8 = arith.truncf %7 : vector<16x128xf32> to vector<16x128xbf16>
    %c0_6 = arith.constant 0 : index
    %c0_7 = arith.constant 0 : index
    %9 = vector.load %arg4[%c0_6, %c0_7] : memref<128x128xbf16, #tpu.memory_space<vmem>>, vector<128x128xbf16>
    %cst_8 = arith.constant dense<0.000000e+00> : vector<16x128xf32>
    %10 = tpu.matmul %8, %9, %cst_8 {dimension_numbers = #tpu.dot_dimension_numbers<[1], [0], [0], [1], [0, 0, 1, 1], [], []>} : vector<16x128xbf16>, vector<128x128xbf16>, vector<16x128xf32> -> vector<16x128xf32>
    %c0_9 = arith.constant 0 : index
    %c0_10 = arith.constant 0 : index
    %11 = vector.load %arg5[%c0_9, %c0_10] : memref<1x128xf32, #tpu.memory_space<vmem>>, vector<1x128xf32>
    %12 = vector.broadcast %11 : vector<1x128xf32> to vector<16x128xf32>
    %13 = arith.addf %10, %12 : vector<16x128xf32>
    %cst_11 = arith.constant 0.000000e+00 : f32
    %14 = vector.broadcast %cst_11 : f32 to vector<16x128xf32>
    %15 = arith.maximumf %13, %14 : vector<16x128xf32>
    %16 = arith.truncf %15 : vector<16x128xf32> to vector<16x128xbf16>
    %c0_12 = arith.constant 0 : index
    %c0_13 = arith.constant 0 : index
    %17 = vector.load %arg6[%c0_12, %c0_13] : memref<128x128xbf16, #tpu.memory_space<vmem>>, vector<128x128xbf16>
    %cst_14 = arith.constant dense<0.000000e+00> : vector<16x128xf32>
    %18 = tpu.matmul %16, %17, %cst_14 {dimension_numbers = #tpu.dot_dimension_numbers<[1], [0], [0], [1], [0, 0, 1, 1], [], []>} : vector<16x128xbf16>, vector<128x128xbf16>, vector<16x128xf32> -> vector<16x128xf32>
    %c0_15 = arith.constant 0 : index
    %c0_16 = arith.constant 0 : index
    %19 = vector.load %arg7[%c0_15, %c0_16] : memref<1x128xf32, #tpu.memory_space<vmem>>, vector<1x128xf32>
    %20 = vector.broadcast %19 : vector<1x128xf32> to vector<16x128xf32>
    %21 = arith.addf %18, %20 : vector<16x128xf32>
    %cst_17 = arith.constant 0.000000e+00 : f32
    %22 = vector.broadcast %cst_17 : f32 to vector<16x128xf32>
    %23 = arith.maximumf %21, %22 : vector<16x128xf32>
    %24 = arith.truncf %23 : vector<16x128xf32> to vector<16x128xbf16>
    %c0_18 = arith.constant 0 : index
    %c0_19 = arith.constant 0 : index
    %25 = vector.load %arg8[%c0_18, %c0_19] : memref<128x128xbf16, #tpu.memory_space<vmem>>, vector<128x128xbf16>
    %cst_20 = arith.constant dense<0.000000e+00> : vector<16x128xf32>
    %26 = tpu.matmul %24, %25, %cst_20 {dimension_numbers = #tpu.dot_dimension_numbers<[1], [0], [0], [1], [0, 0, 1, 1], [], []>} : vector<16x128xbf16>, vector<128x128xbf16>, vector<16x128xf32> -> vector<16x128xf32>
    %c0_21 = arith.constant 0 : index
    %c0_22 = arith.constant 0 : index
    %27 = vector.load %arg9[%c0_21, %c0_22] : memref<1x128xf32, #tpu.memory_space<vmem>>, vector<1x128xf32>
    %28 = vector.broadcast %27 : vector<1x128xf32> to vector<16x128xf32>
    %29 = arith.addf %26, %28 : vector<16x128xf32>
    %cst_23 = arith.constant 0.000000e+00 : f32
    %30 = vector.broadcast %cst_23 : f32 to vector<16x128xf32>
    %31 = arith.maximumf %29, %30 : vector<16x128xf32>
    %32 = arith.truncf %31 : vector<16x128xf32> to vector<16x128xbf16>
    %c0_24 = arith.constant 0 : index
    %c0_25 = arith.constant 0 : index
    %33 = vector.load %arg10[%c0_24, %c0_25] : memref<128x128xbf16, #tpu.memory_space<vmem>>, vector<128x128xbf16>
    %cst_26 = arith.constant dense<0.000000e+00> : vector<16x128xf32>
    %34 = tpu.matmul %32, %33, %cst_26 {dimension_numbers = #tpu.dot_dimension_numbers<[1], [0], [0], [1], [0, 0, 1, 1], [], []>} : vector<16x128xbf16>, vector<128x128xbf16>, vector<16x128xf32> -> vector<16x128xf32>
    %c0_27 = arith.constant 0 : index
    %c0_28 = arith.constant 0 : index
    %35 = vector.load %arg11[%c0_27, %c0_28] : memref<1x128xf32, #tpu.memory_space<vmem>>, vector<1x128xf32>
    %36 = vector.broadcast %35 : vector<1x128xf32> to vector<16x128xf32>
    %37 = arith.addf %34, %36 : vector<16x128xf32>
    %cst_29 = arith.constant 0.000000e+00 : f32
    %38 = vector.broadcast %cst_29 : f32 to vector<16x128xf32>
    %39 = arith.subf %38, %37 : vector<16x128xf32>
    %40 = math.exp %39 : vector<16x128xf32>
    %cst_30 = arith.constant 1.000000e+00 : f32
    %41 = vector.broadcast %cst_30 : f32 to vector<16x128xf32>
    %42 = arith.addf %41, %40 : vector<16x128xf32>
    %43 = tpu.reciprocal %42 {approx = true} : vector<16x128xf32> -> vector<16x128xf32>
    %cst_31 = arith.constant 0.000000e+00 : f32
    %cst_32 = arith.constant 1.000000e+00 : f32
    %44 = vector.broadcast %cst_31 : f32 to vector<16x128xf32>
    %45 = arith.maximumf %44, %43 : vector<16x128xf32>
    %46 = vector.broadcast %cst_32 : f32 to vector<16x128xf32>
    %47 = arith.minimumf %46, %45 : vector<16x128xf32>
    %c0_33 = arith.constant 0 : index
    %c0_34 = arith.constant 0 : index
    %48 = vector.load %arg12[%c0_33, %c0_34] : memref<16x128xf32, #tpu.memory_space<vmem>>, vector<16x128xf32>
    tpu.vector_store %arg12[%c0_33, %c0_34], %47 {strides = array<i32>} : memref<16x128xf32, #tpu.memory_space<vmem>>, vector<16x128xf32>,
    return
  }
  func.func @transform_0(%arg0: i32) -> (i32, i32) {
    %c0_i32 = arith.constant 0 : i32
    %c0_i32_0 = arith.constant 0 : i32
    return %arg0, %c0_i32 : i32, i32
  }
  func.func @transform_1(%arg0: i32) -> (i32, i32) {
    %c0_i32 = arith.constant 0 : i32
    %c0_i32_0 = arith.constant 0 : i32
    %c0_i32_1 = arith.constant 0 : i32
    return %c0_i32, %c0_i32_0 : i32, i32
  }
  func.func @transform_2(%arg0: i32) -> (i32, i32) {
    %c0_i32 = arith.constant 0 : i32
    %c0_i32_0 = arith.constant 0 : i32
    %c0_i32_1 = arith.constant 0 : i32
    return %c0_i32, %c0_i32_0 : i32, i32
  }
  func.func @transform_3(%arg0: i32) -> (i32, i32) {
    %c0_i32 = arith.constant 0 : i32
    %c0_i32_0 = arith.constant 0 : i32
    %c0_i32_1 = arith.constant 0 : i32
    return %c0_i32, %c0_i32_0 : i32, i32
  }
  func.func @transform_4(%arg0: i32) -> (i32, i32) {
    %c0_i32 = arith.constant 0 : i32
    %c0_i32_0 = arith.constant 0 : i32
    %c0_i32_1 = arith.constant 0 : i32
    return %c0_i32, %c0_i32_0 : i32, i32
  }
  func.func @transform_5(%arg0: i32) -> (i32, i32) {
    %c0_i32 = arith.constant 0 : i32
    %c0_i32_0 = arith.constant 0 : i32
    %c0_i32_1 = arith.constant 0 : i32
    return %c0_i32, %c0_i32_0 : i32, i32
  }
  func.func @transform_6(%arg0: i32) -> (i32, i32) {
    %c0_i32 = arith.constant 0 : i32
    %c0_i32_0 = arith.constant 0 : i32
    %c0_i32_1 = arith.constant 0 : i32
    return %c0_i32, %c0_i32_0 : i32, i32
  }
  func.func @transform_7(%arg0: i32) -> (i32, i32) {
    %c0_i32 = arith.constant 0 : i32
    %c0_i32_0 = arith.constant 0 : i32
    %c0_i32_1 = arith.constant 0 : i32
    return %c0_i32, %c0_i32_0 : i32, i32
  }
  func.func @transform_8(%arg0: i32) -> (i32, i32) {
    %c0_i32 = arith.constant 0 : i32
    %c0_i32_0 = arith.constant 0 : i32
    %c0_i32_1 = arith.constant 0 : i32
    return %c0_i32, %c0_i32_0 : i32, i32
  }
  func.func @transform_9(%arg0: i32) -> (i32, i32) {
    %c0_i32 = arith.constant 0 : i32
    %c0_i32_0 = arith.constant 0 : i32
    %c0_i32_1 = arith.constant 0 : i32
    return %c0_i32, %c0_i32_0 : i32, i32
  }
  func.func @transform_10(%arg0: i32) -> (i32, i32) {
    %c0_i32 = arith.constant 0 : i32
    %c0_i32_0 = arith.constant 0 : i32
    %c0_i32_1 = arith.constant 0 : i32
    return %c0_i32, %c0_i32_0 : i32, i32
  }
  func.func @transform_11(%arg0: i32) -> (i32, i32) {
    %c0_i32 = arith.constant 0 : i32
    %c0_i32_0 = arith.constant 0 : i32
    return %arg0, %c0_i32 : i32, i32
  }
}

</mosaic_0001>

<bundles_post_ra>
// kernel: discriminator_forward.1
= control target key start
LH: loop header
LB: loop body
LE: loop exit
PB: predicated region body
PF: predicated region fallthrough
CT: control target
= control target key end

     0   :  { %16 = vsyncpa [#allocation3], 0  ;;  %s1696_s0 = inlined_call_operand.vmem [shape: bf16[16,768], index: 0, kind: input, shape index: {}]   ;;  %s1697_s1 = inlined_call_operand.hbm [shape: bf16[768,128], index: 1, kind: input, shape index: {}]   ;;  %s1698_s2 = inlined_call_operand.vmem [shape: f32[1,128], index: 2, kind: input, shape index: {}]   ;;  %s1699_s3 = inlined_call_operand.vmem [shape: bf16[128,128], index: 3, kind: input, shape index: {}]   ;;  %s1700_s4 = inlined_call_operand.vmem [shape: f32[1,128], index: 4, kind: input, shape index: {}]   ;;  %s1701_s5 = inlined_call_operand.vmem [shape: bf16[128,128], index: 5, kind: input, shape index: {}]   ;;  %s1702_s6 = inlined_call_operand.hbm [shape: f32[1,128], index: 6, kind: input, shape index: {}]   ;;  %s1703_s7 = inlined_call_operand.vmem [shape: bf16[128,128], index: 7, kind: input, shape index: {}]   ;;  %s1704_s8 = inlined_call_operand.hbm [shape: f32[1,128], index: 8, kind: input, shape index: {}]   ;;  %s1705_s9 = inlined_call_operand.vmem [shape: bf16[128,128], index: 9, kind: input, shape index: {}]   ;;  %s1706_s10 = inlined_call_operand.vmem [shape: f32[1,128], index: 10, kind: input, shape index: {}]   ;;  %s1707_s11 = inlined_call_operand.vmem [shape: f32[16,128], index: 11, kind: output, shape index: {}]  }
   0x1   :  { %17 = vsyncpa [#allocation5], 0  ;;  %s46_s19 = sshll.u32 %s1702_s6, 4  ;;  %s1475_s20 = smov [#allocation4]   ;;  %s47_s19 = int_to_ptr.hbm [resolvable:$true] %s46_s19 }
   0x2   :  { %s48_s21 = sshll.u32 %s1475_s20, 4  ;;  %s24_s24 = sshll.u32 %s1697_s1, 4  ;;  %s49_s21 = int_to_ptr.vmem [resolvable:$true] %s48_s21  ;;  %s25_s24 = int_to_ptr.hbm [resolvable:$true] %s24_s24 }
   0x3   :  { %51 = dma.hbm_to_vmem [thread:$0]  %s47_s19, 16, %s49_s21, [#allocation5]  }
   0x4   :  { %s1476_s25 = smov [#allocation2]   ;;  %s1477_s27 = smov 64  }
   0x5   :  { %s26_s26 = sshll.u32 %s1476_s25, 4  ;;  %s1478_s28 = smov 4   ;;  %s27_s26 = int_to_ptr.vmem [resolvable:$true] %s26_s26 }
   0x6   :  { %32 = dma.hbm_to_vmem [thread:$0]  %s25_s24, 6144, %s27_s26, [#allocation3], %s1477_s27, %s1477_s27, %s1478_s28  }
   0x7   :  { %s59_s6 = sshll.u32 %s1704_s8, 4  ;;  %s1479_s12 = smov [#allocation6]   ;;  %s60_s6 = int_to_ptr.hbm [resolvable:$true] %s59_s6 }
   0x8   :  { %s61_s13 = sshll.u32 %s1479_s12, 4  ;;  %s62_s13 = int_to_ptr.vmem [resolvable:$true] %s61_s13 }
   0x9   :  { %64 = dma.hbm_to_vmem [thread:$0]  %s60_s6, 16, %s62_s13, [#allocation5]  }
   0xa   :  { %1471 = dma.done.wait [#allocation3], 6144  }
   0xb   :  { %1472 = vsyncadd [#allocation3], 4294961152 }
   0xc   :  { %1473 = dma.done.wait [#allocation5], 32  }
   0xd   :  { %1474 = vsyncadd [#allocation5], 4294967264  ;;  %v1308_v0 = vld [vmem:[#allocation2 + $0x38] sm:$0xff]  ;;  %v1307_v4 = vld [vmem:[#allocation2 + $0x30] sm:$0xff] }
   0xe   :  { %v1316_v1 = vld [vmem:[#allocation2 + $0x78] sm:$0xff]  ;;  %505 = vmatpush.bf16.msra.mxu0 %v1308_v0  ;;  %v1315_v5 = vld [vmem:[#allocation2 + $0x70] sm:$0xff]  ;;  %v1306_v8 = vld [vmem:[#allocation2 + $0x28] sm:$0xff] }
   0xf   :  { %v1324_v2 = vld [vmem:[#allocation2 + $0xb8] sm:$0xff]  ;;  %519 = vmatpush.bf16.msra.mxu1 %v1316_v1  ;;  %v1323_v6 = vld [vmem:[#allocation2 + $0xb0] sm:$0xff]  ;;  %v1314_v9 = vld [vmem:[#allocation2 + $0x68] sm:$0xff] }
  0x10   :  { %v1332_v3 = vld [vmem:[#allocation2 + $0xf8] sm:$0xff]  ;;  %533 = vmatpush.bf16.msra.mxu2 %v1324_v2  ;;  %v1331_v7 = vld [vmem:[#allocation2 + $0xf0] sm:$0xff]  ;;  %v1322_v10 = vld [vmem:[#allocation2 + $0xa8] sm:$0xff] }
  0x11   :  { %547 = vmatpush.bf16.msra.mxu3 %v1332_v3  ;;  %v1330_v11 = vld [vmem:[#allocation2 + $0xe8] sm:$0xff]  ;;  %v1305_v12 = vld [vmem:[#allocation2 + $0x20] sm:$0xff]  ;;  %v1304_v16 = vld [vmem:[#allocation2 + $0x18] sm:$0xff] }
  0x12   :  { %506 = vmatpush.bf16.msra.mxu0 %v1307_v4  ;;  %v1313_v13 = vld [vmem:[#allocation2 + $0x60] sm:$0xff]  ;;  %v1312_v17 = vld [vmem:[#allocation2 + $0x58] sm:$0xff]  ;;  %v1303_v20 = vld [vmem:[#allocation2 + $0x10] sm:$0xff] }
  0x13   :  { %520 = vmatpush.bf16.msra.mxu1 %v1315_v5  ;;  %v1321_v14 = vld [vmem:[#allocation2 + $0xa0] sm:$0xff]  ;;  %v1320_v18 = vld [vmem:[#allocation2 + $0x98] sm:$0xff]  ;;  %v1311_v21 = vld [vmem:[#allocation2 + $0x50] sm:$0xff] }
  0x14   :  { %534 = vmatpush.bf16.msra.mxu2 %v1323_v6  ;;  %v1329_v15 = vld [vmem:[#allocation2 + $0xe0] sm:$0xff]  ;;  %v1328_v19 = vld [vmem:[#allocation2 + $0xd8] sm:$0xff]  ;;  %v1319_v22 = vld [vmem:[#allocation2 + $0x90] sm:$0xff] }
  0x15   :  { %548 = vmatpush.bf16.msra.mxu3 %v1331_v7  ;;  %v1327_v23 = vld [vmem:[#allocation2 + $0xd0] sm:$0xff]  ;;  %v1302_v24 = vld [vmem:[#allocation2 + $0x8] sm:$0xff]  ;;  %v1301_v28 = vld [vmem:[#allocation2] sm:$0xff] }
  0x16   :  { %507 = vmatpush.bf16.msra.mxu0 %v1306_v8  ;;  %v1310_v25 = vld [vmem:[#allocation2 + $0x48] sm:$0xff]  ;;  %v1309_v29 = vld [vmem:[#allocation2 + $0x40] sm:$0xff]  ;;  %v1298_v31 = vld [vmem:[%s1696_s0 + $0x14] sm:$0xf0] }
  0x17   :  { %521 = vmatpush.bf16.msra.mxu1 %v1314_v9  ;;  %v1318_v26 = vld [vmem:[#allocation2 + $0x88] sm:$0xff]  ;;  %v953_v30 = vld [vmem:[%s1696_s0] sm:$0xf]  ;;  %v1295_v32 = vld [vmem:[%s1696_s0 + $0x4] sm:$0xf] }
  0x18   :  { %535 = vmatpush.bf16.msra.mxu2 %v1322_v10  ;;  %v1326_v27 = vld [vmem:[#allocation2 + $0xc8] sm:$0xff]  ;;  %v955_v33 = vld [vmem:[%s1696_s0 + $0x18] sm:$0xf0]  ;;  %v1317_v36 = vld [vmem:[#allocation2 + $0x80] sm:$0xff]  ;;  %v954_v40 = vor.u32 %v1298_v31, %v953_v30 }
  0x19   :  { %549 = vmatpush.bf16.msra.mxu3 %v1330_v11  ;;  %v1340_v34 = vld [vmem:[#allocation2 + $0x138] sm:$0xff]  ;;  %v1325_v37 = vld [vmem:[#allocation2 + $0xc0] sm:$0xff]  ;;  %v961_v38 = vld [vmem:[%s1696_s0 + $0x8] sm:$0xf]  ;;  %v958_v43 = vor.u32 %v1295_v32, %v955_v33 }
  0x1a   :  { %508 = vmatpush.bf16.msra.mxu0 %v1305_v12  ;;  %v1348_v35 = vld [vmem:[#allocation2 + $0x178] sm:$0xff]  ;;  %v1299_v39 = vld [vmem:[%s1696_s0 + $0x1c] sm:$0xf0]  ;;  %v1296_v41 = vld [vmem:[%s1696_s0 + $0xc] sm:$0xf] }
  0x1b   :  { %522 = vmatpush.bf16.msra.mxu1 %v1313_v13  ;;  %v963_v42 = vld [vmem:[%s1696_s0 + $0x20] sm:$0xf0]  ;;  %v1339_v44 = vld [vmem:[#allocation2 + $0x130] sm:$0xff]  ;;  %v962_v46 = vor.u32 %v1299_v39, %v961_v38  ;;  %v1338_v48 = vld [vmem:[#allocation2 + $0x128] sm:$0xff] }
  0x1c   :  { %536 = vmatpush.bf16.msra.mxu2 %v1321_v14  ;;  %v1347_v45 = vld [vmem:[#allocation2 + $0x170] sm:$0xff]  ;;  %v966_v47 = vor.u32 %v1296_v41, %v963_v42  ;;  %v1346_v49 = vld [vmem:[#allocation2 + $0x168] sm:$0xff]  ;;  %v1337_v50 = vld [vmem:[#allocation2 + $0x120] sm:$0xff] }
  0x1d   :  { %550 = vmatpush.bf16.msra.mxu3 %v1329_v15  ;;  %v1345_v51 = vld [vmem:[#allocation2 + $0x160] sm:$0xff]  ;;  %v1336_v52 = vld [vmem:[#allocation2 + $0x118] sm:$0xff]  ;;  %v1335_v54 = vld [vmem:[#allocation2 + $0x110] sm:$0xff] }
  0x1e   :  { %509 = vmatpush.bf16.msra.mxu0 %v1304_v16  ;;  %v1344_v53 = vld [vmem:[#allocation2 + $0x158] sm:$0xff]  ;;  %v1343_v55 = vld [vmem:[#allocation2 + $0x150] sm:$0xff]  ;;  %v1334_v56 = vld [vmem:[#allocation2 + $0x108] sm:$0xff] }
  0x1f   :  { %523 = vmatpush.bf16.msra.mxu1 %v1312_v17  ;;  %v1342_v57 = vld [vmem:[#allocation2 + $0x148] sm:$0xff]  ;;  %v1333_v58 = vld [vmem:[#allocation2 + $0x100] sm:$0xff]  ;;  %v969_v60 = vld [vmem:[%s1696_s0 + $0x10] sm:$0xf] }
  0x20   :  { %537 = vmatpush.bf16.msra.mxu2 %v1320_v18  ;;  %v1341_v59 = vld [vmem:[#allocation2 + $0x140] sm:$0xff]  ;;  %v1300_v61 = vld [vmem:[%s1696_s0 + $0x24] sm:$0xf0]  ;;  %v1297_v62 = vld [vmem:[%s1696_s0 + $0x14] sm:$0xf] }
  0x21   :  { %551 = vmatpush.bf16.msra.mxu3 %v1328_v19  ;;  %v971_v63 = vld [vmem:[%s1696_s0 + $0x28] sm:$0xf0]  ;;  %v970_v0 = vor.u32 %v1300_v61, %v969_v60  ;;  %v1356_v2 = vld [vmem:[%s1699_s3 + $0x38] sm:$0xff]  ;;  %v1355_v3 = vld [vmem:[%s1699_s3 + $0x30] sm:$0xff] }
  0x22   :  { %510 = vmatpush.bf16.msra.mxu0 %v1303_v20  ;;  %v974_v1 = vor.u32 %v1297_v62, %v971_v63  ;;  %v1354_v4 = vld [vmem:[%s1699_s3 + $0x28] sm:$0xff]  ;;  %v1353_v5 = vld [vmem:[%s1699_s3 + $0x20] sm:$0xff]  ;;  %v1352_v6 = vld [vmem:[%s1699_s3 + $0x18] sm:$0xff] }
  0x23   :  { %524 = vmatpush.bf16.msra.mxu1 %v1311_v21  ;;  %v1351_v7 = vld [vmem:[%s1699_s3 + $0x10] sm:$0xff]  ;;  %v1350_v8 = vld [vmem:[%s1699_s3 + $0x8] sm:$0xff]  ;;  %v1349_v9 = vld [vmem:[%s1699_s3] sm:$0xff] }
  0x24   :  { %538 = vmatpush.bf16.msra.mxu2 %v1319_v22  ;;  %v1364_v12 = vld [vmem:[%s1701_s5 + $0x38] sm:$0xff]  ;;  %v1386_v13 = vld [vmem:[%s1698_s2] ss:$0 sm:$0xff]  ;;  %v1363_v14 = vld [vmem:[%s1701_s5 + $0x30] sm:$0xff] }
  0x25   :  { %552 = vmatpush.bf16.msra.mxu3 %v1327_v23  ;;  %v1362_v17 = vld [vmem:[%s1701_s5 + $0x28] sm:$0xff]  ;;  %v1361_v23 = vld [vmem:[%s1701_s5 + $0x20] sm:$0xff]  ;;  %v1360_v42 = vld [vmem:[%s1701_s5 + $0x18] sm:$0xff] }
  0x26   :  { %511 = vmatpush.bf16.msra.mxu0 %v1302_v24  ;;  %v1366_v60 = vld [vmem:[%s1703_s7 + $0x8] sm:$0xff]  ;;  %v1365_v61 = vld [vmem:[%s1703_s7] sm:$0xff]  ;;  %v1380_v62 = vld [vmem:[%s1705_s9 + $0x38] sm:$0xff] }
  0x27   :  { %525 = vmatpush.bf16.msra.mxu1 %v1310_v25  ;;  %v1379_v63 = vld [vmem:[%s1705_s9 + $0x30] sm:$0xff] }
  0x28   :  { %539 = vmatpush.bf16.msra.mxu2 %v1318_v26 }
  0x29   :  { %553 = vmatpush.bf16.msra.mxu3 %v1326_v27 }
  0x2a   :  { %512 = vmatpush.bf16.msra.mxu0 %v1301_v28 }
  0x2b   :  { %526 = vmatpush.bf16.msra.mxu1 %v1309_v29 }
  0x2c   :  { %540 = vmatpush.bf16.msra.mxu2 %v1317_v36 }
  0x2d   :  { %554 = vmatpush.bf16.msra.mxu3 %v1325_v37  ;;  %513 = vmatmul.bf16.vlgmr.msra.gmra.mxu0 %v954_v40 }
  0x2e   :  { %561 = vmatpush.bf16.msrb.mxu0 %v1340_v34  ;;  %527 = vmatmul.bf16.vlgmr.msra.gmra.mxu1 %v958_v43  ;;  %v1359_v43 = vld [vmem:[%s1701_s5 + $0x10] sm:$0xff] }
  0x2f   :  { %575 = vmatpush.bf16.msrb.mxu1 %v1348_v35  ;;  %541 = vmatmul.bf16.vlgmr.msra.gmra.mxu2 %v962_v46  ;;  %v1372_v46 = vld [vmem:[%s1703_s7 + $0x38] sm:$0xff] }
  0x30   :  { %555 = vmatmul.bf16.vlgmr.msra.gmra.mxu3 %v966_v47  ;;  %660 = vmatpush.bf16.msrb.mxu2 %v1356_v2  ;;  %v1371_v47 = vld [vmem:[%s1703_s7 + $0x30] sm:$0xff] }
  0x31   :  { %745 = vmatpush.bf16.msrb.mxu3 %v1364_v12  ;;  %v1374_v12 = vld [vmem:[%s1705_s9 + $0x8] sm:$0xff] }
  0x32   :  { %562 = vmatpush.bf16.msrb.mxu0 %v1339_v44  ;;  %v1358_v44 = vld [vmem:[%s1701_s5 + $0x8] sm:$0xff] }
  0x33   :  { %576 = vmatpush.bf16.msrb.mxu1 %v1347_v45  ;;  %v1357_v45 = vld [vmem:[%s1701_s5] sm:$0xff] }
  0x34   :  { %661 = vmatpush.bf16.msrb.mxu2 %v1355_v3  ;;  %v1388_v3 = vld [vmem:[#allocation4] ss:$0 sm:$0xff] }
  0x35   :  { %746 = vmatpush.bf16.msrb.mxu3 %v1363_v14 }
  0x36   :  { %563 = vmatpush.bf16.msrb.mxu0 %v1338_v48  ;;  %v1370_v48 = vld [vmem:[%s1703_s7 + $0x28] sm:$0xff] }
  0x37   :  { %577 = vmatpush.bf16.msrb.mxu1 %v1346_v49  ;;  %v1369_v49 = vld [vmem:[%s1703_s7 + $0x20] sm:$0xff] }
  0x38   :  { %662 = vmatpush.bf16.msrb.mxu2 %v1354_v4 }
  0x39   :  { %747 = vmatpush.bf16.msrb.mxu3 %v1362_v17 }
  0x3a   :  { %564 = vmatpush.bf16.msrb.mxu0 %v1337_v50 }
  0x3b   :  { %578 = vmatpush.bf16.msrb.mxu1 %v1345_v51  ;;  %v1387_v51 = vld [vmem:[%s1700_s4] ss:$0 sm:$0xff] }
  0x3c   :  { %663 = vmatpush.bf16.msrb.mxu2 %v1353_v5 }
  0x3d   :  { %748 = vmatpush.bf16.msrb.mxu3 %v1361_v23 }
  0x3e   :  { %565 = vmatpush.bf16.msrb.mxu0 %v1336_v52 }
  0x3f   :  { %579 = vmatpush.bf16.msrb.mxu1 %v1344_v53 }
  0x40   :  { %664 = vmatpush.bf16.msrb.mxu2 %v1352_v6 }
  0x41   :  { %749 = vmatpush.bf16.msrb.mxu3 %v1360_v42 }
  0x42   :  { %566 = vmatpush.bf16.msrb.mxu0 %v1335_v54 }
  0x43   :  { %580 = vmatpush.bf16.msrb.mxu1 %v1343_v55 }
  0x44   :  { %665 = vmatpush.bf16.msrb.mxu2 %v1351_v7 }
  0x45   :  { %750 = vmatpush.bf16.msrb.mxu3 %v1359_v43 }
  0x46   :  { %567 = vmatpush.bf16.msrb.mxu0 %v1334_v56 }
  0x47   :  { %581 = vmatpush.bf16.msrb.mxu1 %v1342_v57 }
  0x48   :  { %666 = vmatpush.bf16.msrb.mxu2 %v1350_v8 }
  0x49   :  { %751 = vmatpush.bf16.msrb.mxu3 %v1358_v44 }
  0x4a   :  { %568 = vmatpush.bf16.msrb.mxu0 %v1333_v58  ;;  %v1368_v58 = vld [vmem:[%s1703_s7 + $0x18] sm:$0xff] }
  0x4b   :  { %582 = vmatpush.bf16.msrb.mxu1 %v1341_v59  ;;  %v1367_v59 = vld [vmem:[%s1703_s7 + $0x10] sm:$0xff] }
  0x4c   :  { %667 = vmatpush.bf16.msrb.mxu2 %v1349_v9 }
  0x4d   :  { %569 = vmatmul.bf16.vlgmr.msrb.gmra.mxu0 %v970_v0  ;;  %752 = vmatpush.bf16.msrb.mxu3 %v1357_v45  ;;  %v1378_v0 = vld [vmem:[%s1705_s9 + $0x28] sm:$0xff] }
  0x4e   :  { %583 = vmatmul.bf16.vlgmr.msrb.gmra.mxu1 %v974_v1  ;;  %830 = vmatpush.bf16.msra.mxu0 %v1372_v46  ;;  %v1377_v1 = vld [vmem:[%s1705_s9 + $0x20] sm:$0xff] }
  0x4f   :  { %915 = vmatpush.bf16.msra.mxu1 %v1380_v62 }
  0x52   :  { %831 = vmatpush.bf16.msra.mxu0 %v1371_v47 }
  0x53   :  { %916 = vmatpush.bf16.msra.mxu1 %v1379_v63 }
  0x56   :  { %832 = vmatpush.bf16.msra.mxu0 %v1370_v48 }
  0x57   :  { %917 = vmatpush.bf16.msra.mxu1 %v1378_v0 }
  0x5a   :  { %833 = vmatpush.bf16.msra.mxu0 %v1369_v49 }
  0x5b   :  { %918 = vmatpush.bf16.msra.mxu1 %v1377_v1 }
  0x5e   :  { %834 = vmatpush.bf16.msra.mxu0 %v1368_v58 }
  0x62   :  { %835 = vmatpush.bf16.msra.mxu0 %v1367_v59 }
  0x66   :  { %836 = vmatpush.bf16.msra.mxu0 %v1366_v60 }
  0x6a   :  { %837 = vmatpush.bf16.msra.mxu0 %v1365_v61 }
  0xaa   :  { %v514_v10 = vpop.f32.mrf.mxu0 }
  0xab   :  { %v528_v11 = vpop.f32.mrf.mxu1  ;;  %v515_v16 = vadd.f32 %v1386_v13, %v514_v10  ;;  %v1376_v10 = vld [vmem:[%s1705_s9 + $0x18] sm:$0xff] }
  0xac   :  { %919 = vmatpush.bf16.msra.mxu1 %v1376_v10 }
  0xad   :  { %v529_v21 = vadd.f32 %v528_v11, %v515_v16  ;;  %v1375_v11 = vld [vmem:[%s1705_s9 + $0x10] sm:$0xff] }
  0xb0   :  { %920 = vmatpush.bf16.msra.mxu1 %v1375_v11 }
  0xb2   :  { %v542_v15 = vpop.f32.mrf.mxu2  ;;  %v516_v18 = vpop.f32.mrf.mxu0 }
  0xb3   :  { %v530_v19 = vpop.f32.mrf.mxu1  ;;  %v556_v20 = vpop.f32.mrf.mxu3  ;;  %v517_v22 = vadd.f32 %v1386_v13, %v516_v18  ;;  %v543_v24 = vadd.f32 %v542_v15, %v529_v21  ;;  %v1373_v13 = vld [vmem:[%s1705_s9] sm:$0xff] }
  0xb4   :  { %921 = vmatpush.bf16.msra.mxu1 %v1374_v12  ;;  %v1389_v15 = vld [vmem:[#allocation6] ss:$0 sm:$0xff] }
  0xb5   :  { %v531_v25 = vadd.f32 %v530_v19, %v517_v22  ;;  %v557_v29 = vadd.f32 %v556_v20, %v543_v24  ;;  %v1390_v22 = vld [vmem:[%s1706_s10] ss:$0 sm:$0xff] }
  0xb8   :  { %922 = vmatpush.bf16.msra.mxu1 %v1373_v13 }
  0xba   :  { %v544_v26 = vpop.f32.mrf.mxu2 }
  0xbb   :  { %v545_v30 = vadd.f32 %v544_v26, %v531_v25  ;;  %v558_v31 = vpop.f32.mrf.mxu3 }
  0xbd   :  { %v559_v33 = vadd.f32 %v558_v31, %v545_v30 }
  0xca   :  { %v570_v27 = vpop.f32.mrf.mxu0 }
  0xcb   :  { %v584_v28 = vpop.f32.mrf.mxu1  ;;  %v571_v32 = vadd.f32 %v570_v27, %v557_v29 }
  0xcd   :  { %v585_v35 = vadd.f32 %v584_v28, %v571_v32 }
  0xcf   :  { %v589_v39 = vmax.f32 %v585_v35, 0.0 }
  0xd2   :  { %v572_v34 = vpop.f32.mrf.mxu0 }
  0xd3   :  { %v573_v36 = vadd.f32 %v572_v34, %v559_v33  ;;  %v586_v37 = vpop.f32.mrf.mxu1 }
  0xd5   :  { %v587_v38 = vadd.f32 %v586_v37, %v573_v36 }
  0xd7   :  { %v590_v40 = vmax.f32 %v587_v38, 0.0 }
  0xd9   :  { %v591_v41 = vpack.c.bf16 %v590_v40, %v589_v39 }
  0xdb   :  { %668 = vmatmul.bf16.vlgmr.msrb.gmra.mxu2 %v591_v41 }
 0x15e   :  { %v669_v50 = vpop.f32.mrf.mxu2 }
 0x15f   :  { %v670_v52 = vadd.f32 %v1387_v51, %v669_v50 }
 0x161   :  { %v674_v55 = vmax.f32 %v670_v52, 0.0 }
 0x166   :  { %v671_v53 = vpop.f32.mrf.mxu2 }
 0x167   :  { %v672_v54 = vadd.f32 %v1387_v51, %v671_v53 }
 0x169   :  { %v675_v56 = vmax.f32 %v672_v54, 0.0 }
 0x16b   :  { %v676_v57 = vpack.c.bf16 %v675_v56, %v674_v55 }
 0x16d   :  { %753 = vmatmul.bf16.vlgmr.msrb.gmra.mxu3 %v676_v57 }
 0x1f0   :  { %v754_v2 = vpop.f32.mrf.mxu3 }
 0x1f1   :  { %v755_v4 = vadd.f32 %v1388_v3, %v754_v2 }
 0x1f3   :  { %v759_v7 = vmax.f32 %v755_v4, 0.0 }
 0x1f8   :  { %v756_v5 = vpop.f32.mrf.mxu3 }
 0x1f9   :  { %v757_v6 = vadd.f32 %v1388_v3, %v756_v5 }
 0x1fb   :  { %v760_v8 = vmax.f32 %v757_v6, 0.0 }
 0x1fd   :  { %v761_v9 = vpack.c.bf16 %v760_v8, %v759_v7 }
 0x1ff   :  { %838 = vmatmul.bf16.vlgmr.msra.gmra.mxu0 %v761_v9 }
 0x27c   :  { %v839_v14 = vpop.f32.mrf.mxu0 }
 0x27d   :  { %v840_v16 = vadd.f32 %v1389_v15, %v839_v14 }
 0x27f   :  { %v844_v19 = vmax.f32 %v840_v16, 0.0 }
 0x284   :  { %v841_v17 = vpop.f32.mrf.mxu0 }
 0x285   :  { %v842_v18 = vadd.f32 %v1389_v15, %v841_v17 }
 0x287   :  { %v845_v20 = vmax.f32 %v842_v18, 0.0 }
 0x289   :  { %v846_v21 = vpack.c.bf16 %v845_v20, %v844_v19 }
 0x28b   :  { %923 = vmatmul.bf16.vlgmr.msra.gmra.mxu1 %v846_v21 }
 0x308   :  { %v924_v23 = vpop.f32.mrf.mxu1 }
 0x309   :  { %v925_v24 = vadd.f32 %v1390_v22, %v924_v23 }
 0x30b   :  { %v929_v25 = vsub.f32 0.0, %v925_v24 }
 0x30d   :  { %v931_v26 = vmul.f32 1.442695, %v929_v25 }
 0x30f   :  { %1391 = vpow2.f32 %v931_v26 }
 0x310   :  { %v926_v27 = vpop.f32.mrf.mxu1 }
 0x311   :  { %v927_v28 = vadd.f32 %v1390_v22, %v926_v27 }
 0x313   :  { %v930_v29 = vsub.f32 0.0, %v927_v28 }
 0x315   :  { %v1392_v30 = vpop.eup %1391  ;;  %v933_v31 = vmul.f32 1.442695, %v930_v29 }
 0x316   :  { %v935_v32 = vadd.f32 1.0, %v1392_v30 }
 0x317   :  { %1393 = vpow2.f32 %v933_v31 }
 0x318   :  { %1395 = vrcp.f32 %v935_v32 }
 0x31d   :  { %v1394_v33 = vpop.eup %1393 }
 0x31e   :  { %v1396_v34 = vpop.eup %1395  ;;  %v936_v35 = vadd.f32 1.0, %v1394_v33 }
 0x31f   :  { %v939_v36 = vmax.f32 %v1396_v34, 0.0 }
 0x320   :  { %1397 = vrcp.f32 %v936_v35 }
 0x321   :  { %v941_v37 = vmin.f32 %v939_v36, 1.0 }
 0x323   :  { %943 = vst [vmem:[%s1707_s11] sm:$0xff] %v941_v37 }
 0x326   :  { %v1398_v38 = vpop.eup %1397 }
 0x327   :  { %v940_v39 = vmax.f32 %v1398_v38, 0.0 }
 0x329   :  { %v942_v40 = vmin.f32 %v940_v39, 1.0 }
 0x32b   :  { %944 = vst [vmem:[%s1707_s11 + $0x8] sm:$0xff] %v942_v40 }
 0x32c   :  { %949 = vsyncpa [#allocation3], 1 }
 0x32d   :  { %950 = vsyncpa [#allocation5], 1 }

</bundles_post_ra>
